<compile_context>
chip_gen: v5e
topology: v5e:2x2
jax: 0.10.0
libtpu: 0.0.40
codegen_flags: <defaults>
</compile_context>

<pallas_src>
import jax
import jax.numpy as jnp
from jax.experimental import pallas as pl
from jax.experimental.pallas import tpu as pltpu


# ---------------------------------------------------------------------------
# Pallas kernel: KGNN head over a block of BB batch elements
# ---------------------------------------------------------------------------
def kgnn_head_kernel(to_ref, ao_ref, tk_ref, ak_ref, adj_ref, mask_ref,
                     gcw_ref, gcb_ref, wh_ref, bh_ref, out_ref):
    f32 = jnp.float32

    text_out = to_ref[...]        # (BB, L, D)  BiLSTM output stand-in
    aspect_out = ao_ref[...]      # (BB, A, D)
    tk = tk_ref[...]              # (BB, L, K)  text graph knowledge
    ak = ak_ref[...]              # (BB, A, K)  aspect graph knowledge
    adj = adj_ref[...]            # (BB, L, L)
    mask = mask_ref[...]          # (BB, L, 1)

    BB, L, D = text_out.shape
    K = tk.shape[2]

    def mm(a, b):                 # 2-D matmul, f32 accumulate on MXU
        return jnp.dot(a, b, preferred_element_type=f32)

    def bmm(a, b):                # batched a @ b
        return jnp.einsum('bij,bjk->bik', a, b, preferred_element_type=f32)

    def bmm_t(a, b):              # batched a @ b^T (contract last dims)
        return jnp.einsum('bik,bjk->bij', a, b, preferred_element_type=f32)

    def softmax_last(s):
        m = jnp.max(s, axis=-1, keepdims=True)
        e = jnp.exp(s - m)
        return e * pl.reciprocal(jnp.sum(e, axis=-1, keepdims=True), approx=True)

    # ---- GraphConvolution x2 (gc1, gc2) + ReLU -----------------------------
    gcw = gcw_ref[...]            # (2D, D): rows [gc1_w | gc2_w]
    gcb = gcb_ref[...]            # (2, D) : rows [gc1_b | gc2_b]
    w1, w2 = gcw[:D], gcw[D:]
    b1, b2 = gcb[0:1], gcb[1:2]

    inv_denom = pl.reciprocal(jnp.sum(adj, axis=2, keepdims=True) + 1.0,
                              approx=True)                       # (BB, L, 1)

    h1 = mm(text_out.reshape(BB * L, D), w1).reshape(BB, L, D)
    x1 = jnp.maximum(bmm(adj, h1) * inv_denom + b1, 0.0)
    h2 = mm(x1.reshape(BB * L, D), w2).reshape(BB, L, D)
    x2 = jnp.maximum(bmm(adj, h2) * inv_denom + b2, 0.0)

    # ---- location_feature(x, mask) + aspect-guided pooling ('x' branch) ----
    xm = mask * x2                                               # (BB, L, D)
    alpha_mat = bmm_t(xm, text_out)                              # (BB, L, L)
    alpha = softmax_last(jnp.sum(alpha_mat, axis=1, keepdims=True))  # (BB,1,L)
    x_vec = bmm(alpha, text_out)[:, 0, :]                        # (BB, D)

    # ---- self-attention + cross-attention ('y' branch) ---------------------
    self_score = softmax_last(bmm_t(text_out, text_out))         # (BB, L, L)
    text_att = bmm(self_score, text_out)                         # (BB, L, D)
    a_t = bmm_t(aspect_out, text_out)                            # (BB, A, L) reused
    score = softmax_last(a_t)
    y_vec = jnp.max(bmm(score, text_att), axis=1)                # (BB, D) max_pool1d

    # ---- knowledge attention ('z' branch) ----------------------------------
    # concat([tk, text_out]) @ concat([ak, aspect_out]).T decomposed into two
    # matmuls (algebraically identical); a_t reused from above.
    k_score = softmax_last(bmm_t(ak, tk) + a_t)                  # (BB, A, L)
    z_k = jnp.max(bmm(k_score, tk), axis=1)                      # (BB, K)
    z_t = jnp.max(bmm(k_score, text_out), axis=1)                # (BB, D)

    # ---- fused FC heads + final Conv1d (folded into one lane-dense matmul) --
    # wh rows ordered [x(D) | y(D) | z_k(K) | z_t(D)], lanes padded to 128.
    wh = wh_ref[...]
    out = (mm(x_vec, wh[:D]) + mm(y_vec, wh[D:2 * D])
           + mm(z_k, wh[2 * D:2 * D + K]) + mm(z_t, wh[2 * D + K:])
           + bh_ref[...])                                        # (BB, 128)
    out_ref[...] = out


# ---------------------------------------------------------------------------
# Wrapper: weight fusion + pallas_call
# ---------------------------------------------------------------------------
def _fuse_head_params(p, D, K, nout):
    """Fold fc / fc2 / fc3 + Conv1d(3,3,k=3) into one (3D+K, nout) matrix."""
    conv_w = p["conv_w"]                     # (out_c=3, in_c=3, k=3)
    c0 = conv_w[:, :, 0].T                   # (3, 3): head-0 (xz) logits -> final
    c1 = conv_w[:, :, 1].T                   # head-1 (yz)
    c2 = conv_w[:, :, 2].T                   # head-2 (xy)
    fc, fc2, fc3 = p["fc_w"], p["fc2_w"], p["fc3_w"]
    w_x = fc[:D] @ c0 + fc3[:D] @ c2                             # (D, 3)
    w_y = fc2[:D] @ c1 + fc3[D:] @ c2                            # (D, 3)
    w_zk = fc[D:D + K] @ c0 + fc2[D:D + K] @ c1                  # (K, 3)
    w_zt = fc[D + K:] @ c0 + fc2[D + K:] @ c1                    # (D, 3)
    w = jnp.concatenate([w_x, w_y, w_zk, w_zt], axis=0)          # (3D+K, 3)
    b = (p["conv_b"] + p["fc_b"] @ c0 + p["fc2_b"] @ c1
         + p["fc3_b"] @ c2)                                      # (1, 3)
    w = jnp.pad(w, ((0, 0), (0, nout - 3)))
    b = jnp.pad(b, ((0, 0), (0, nout - 3)))
    return w, b


def kgnn_head_pallas(text_out, aspect_out, tk, ak, adj, mask, p, *, block_b=256):
    B, L, D = text_out.shape
    A = aspect_out.shape[1]
    K = tk.shape[2]
    NOUT = 128                                                   # lane-dense output

    mask3 = mask[:, :, None].astype(jnp.float32)                 # (B, L, 1)

    # Batch blocking (pad B up to a multiple of BB; padded rows are harmless
    # all-zero elements whose outputs are discarded below).
    BB = min(block_b, B)
    B_pad = -(-B // BB) * BB
    if B_pad != B:
        padb = lambda x: jnp.pad(x, ((0, B_pad - B),) + ((0, 0),) * (x.ndim - 1))
        text_out, aspect_out, tk, ak, adj, mask3 = (
            padb(text_out), padb(aspect_out), padb(tk), padb(ak),
            padb(adj), padb(mask3))

    gcw = jnp.concatenate([p["gc1_w"], p["gc2_w"]], axis=0)      # (2D, D)
    gcb = jnp.concatenate([p["gc1_b"], p["gc2_b"]], axis=0)      # (2, D)
    wh, bh = _fuse_head_params(p, D, K, NOUT)

    def batched(*dims):
        return pl.BlockSpec((BB,) + dims, lambda b, _d=len(dims): (b,) + (0,) * _d)

    def shared(*dims):
        return pl.BlockSpec(dims, lambda b, _d=len(dims): (0,) * _d)

    out = pl.pallas_call(
        kgnn_head_kernel,
        out_shape=jax.ShapeDtypeStruct((B_pad, NOUT), jnp.float32),
        grid=(B_pad // BB,),
        in_specs=[batched(L, D), batched(A, D), batched(L, K), batched(A, K),
                  batched(L, L), batched(L, 1),
                  shared(2 * D, D), shared(2, D),
                  shared(3 * D + K, NOUT), shared(1, NOUT)],
        out_specs=pl.BlockSpec((BB, NOUT), lambda b: (b, 0)),
        compiler_params=pltpu.CompilerParams(
            dimension_semantics=("parallel",),
            vmem_limit_bytes=48 * 1024 * 1024),
    )(text_out, aspect_out, tk, ak, adj, mask3, gcw, gcb, wh, bh)

    return out[:B, :3]                                           # (B, 3)


def kgnn_bert_forward(params, feature, aspect, offset, adj, mask):
    """Eval-mode forward of KGNN_BERT (is_bert == 2, 'rest'-dataset branch)."""
    # --- BERT stand-in: deterministic embedding table lookup ----------------
    text = params["bert_embed"][feature]                         # (B, L, dim_w)
    aspect_embed = params["bert_embed"][aspect]                  # (B, A, dim_w)

    # location_feature(text, offset)
    w_off = offset[:, : feature.shape[1]]
    text = w_off[:, :, None] * text

    # graph knowledge embeddings (SqueezeEmbedding = identity, full lengths)
    text_knowledge = params["graph_embed"][feature]              # (B, L, K)
    aspect_knowledge = params["graph_embed"][aspect]             # (B, A, K)

    # --- DynamicLSTM stand-in: linear projection to 2*hid_num ---------------
    text_out = text @ params["lstm_t_w"] + params["lstm_t_b"]            # (B, L, 2H)
    aspect_out = aspect_embed @ params["lstm_a_w"] + params["lstm_a_b"]  # (B, A, 2H)

    seq_len = text_out.shape[1]
    adj = adj[:, :seq_len, :seq_len].astype(jnp.float32)

    return kgnn_head_pallas(text_out, aspect_out,
                            text_knowledge, aspect_knowledge,
                            adj, mask, params)


# ---------------------------------------------------------------------------
# Deterministic parameter / input construction
# ---------------------------------------------------------------------------
def make_params(key, vocab, dim_w, hid, dim_k):
    D = 2 * hid
    ks = jax.random.split(key, 24)
    n = lambda k, s, sc=0.1: sc * jax.random.normal(k, s, dtype=jnp.float32)
    return {
        "bert_embed": n(ks[0], (vocab, dim_w), 0.5),
        "graph_embed": n(ks[1], (vocab, dim_k), 0.5),
        "lstm_t_w": n(ks[2], (dim_w, D)), "lstm_t_b": n(ks[3], (D,)),
        "lstm_a_w": n(ks[4], (dim_w, D)), "lstm_a_b": n(ks[5], (D,)),
        "gc1_w": n(ks[6], (D, D)), "gc1_b": n(ks[7], (1, D)),
        "gc2_w": n(ks[8], (D, D)), "gc2_b": n(ks[9], (1, D)),
        "fc_w": n(ks[10], (2 * D + dim_k, 3)), "fc_b": n(ks[11], (1, 3)),
        "fc2_w": n(ks[12], (2 * D + dim_k, 3)), "fc2_b": n(ks[13], (1, 3)),
        "fc3_w": n(ks[14], (2 * D, 3)), "fc3_b": n(ks[15], (1, 3)),
        "conv_w": n(ks[16], (3, 3, 3), 0.2), "conv_b": n(ks[17], (1, 3)),
    }


if __name__ == "__main__":
    B, L, A = 2, 8, 8
    vocab, dim_w, hid, dim_k = 50, 16, 16, 32   # D = 2*hid = 32, K = 32

    root = jax.random.PRNGKey(0)
    kp, kf, ka, ko, kj, km = jax.random.split(root, 6)

    params = make_params(kp, vocab, dim_w, hid, dim_k)

    # nonzero ids -> full lengths (SqueezeEmbedding is identity)
    feature = jax.random.randint(kf, (B, L), 1, vocab)
    aspect = jax.random.randint(ka, (B, A), 1, vocab)
    offset = jax.random.uniform(ko, (B, L), minval=0.5, maxval=1.5,
                                dtype=jnp.float32)
    adj = (jax.random.uniform(kj, (B, L, L)) < 0.5).astype(jnp.float32)
    mask = (jax.random.uniform(km, (B, L)) < 0.7).astype(jnp.float32)

    out = kgnn_bert_forward(params, feature, aspect, offset, adj, mask)
    out = jax.block_until_ready(out)
    assert out.shape == (B, 3)
    print("KERNEL_OK")
</pallas_src>

<mosaic_0001>
module attributes {stable_mosaic.version = 11 : i64} {
  func.func @kgnn_head_kernel(%arg0: i32, %arg1: memref<2x8x32xf32, #tpu.memory_space<vmem>>, %arg2: memref<2x8x32xf32, #tpu.memory_space<vmem>>, %arg3: memref<2x8x32xf32, #tpu.memory_space<vmem>>, %arg4: memref<2x8x32xf32, #tpu.memory_space<vmem>>, %arg5: memref<2x8x8xf32, #tpu.memory_space<vmem>>, %arg6: memref<2x8x1xf32, #tpu.memory_space<vmem>>, %arg7: memref<64x32xf32, #tpu.memory_space<vmem>>, %arg8: memref<2x32xf32, #tpu.memory_space<vmem>>, %arg9: memref<128x128xf32, #tpu.memory_space<vmem>>, %arg10: memref<1x128xf32, #tpu.memory_space<vmem>>, %arg11: memref<2x128xf32, #tpu.memory_space<vmem>>) attributes {dimension_semantics = [#tpu.dimension_semantics<parallel>], iteration_bounds = array<i64: 1>, scalar_prefetch = 0 : i64, scratch_operands = 0 : i64, tpu.core_type = #tpu.core_type<tc>, window_params = [{transform_indices = @transform_0, window_bounds = array<i64: 2, 8, 32>}, {transform_indices = @transform_1, window_bounds = array<i64: 2, 8, 32>}, {transform_indices = @transform_2, window_bounds = array<i64: 2, 8, 32>}, {transform_indices = @transform_3, window_bounds = array<i64: 2, 8, 32>}, {transform_indices = @transform_4, window_bounds = array<i64: 2, 8, 8>}, {transform_indices = @transform_5, window_bounds = array<i64: 2, 8, 1>}, {pipeline_mode = #tpu.pipeline_mode<synchronous>, transform_indices = @transform_6, window_bounds = array<i64: 64, 32>}, {pipeline_mode = #tpu.pipeline_mode<synchronous>, transform_indices = @transform_7, window_bounds = array<i64: 2, 32>}, {pipeline_mode = #tpu.pipeline_mode<synchronous>, transform_indices = @transform_8, window_bounds = array<i64: 128, 128>}, {pipeline_mode = #tpu.pipeline_mode<synchronous>, transform_indices = @transform_9, window_bounds = array<i64: 1, 128>}, {transform_indices = @transform_10, window_bounds = array<i64: 2, 128>}]} {
    %c0 = arith.constant 0 : index
    %c0_0 = arith.constant 0 : index
    %c0_1 = arith.constant 0 : index
    %0 = vector.load %arg1[%c0, %c0_0, %c0_1] : memref<2x8x32xf32, #tpu.memory_space<vmem>>, vector<2x8x32xf32>
    %c0_2 = arith.constant 0 : index
    %c0_3 = arith.constant 0 : index
    %c0_4 = arith.constant 0 : index
    %1 = vector.load %arg2[%c0_2, %c0_3, %c0_4] : memref<2x8x32xf32, #tpu.memory_space<vmem>>, vector<2x8x32xf32>
    %c0_5 = arith.constant 0 : index
    %c0_6 = arith.constant 0 : index
    %c0_7 = arith.constant 0 : index
    %2 = vector.load %arg3[%c0_5, %c0_6, %c0_7] : memref<2x8x32xf32, #tpu.memory_space<vmem>>, vector<2x8x32xf32>
    %c0_8 = arith.constant 0 : index
    %c0_9 = arith.constant 0 : index
    %c0_10 = arith.constant 0 : index
    %3 = vector.load %arg4[%c0_8, %c0_9, %c0_10] : memref<2x8x32xf32, #tpu.memory_space<vmem>>, vector<2x8x32xf32>
    %c0_11 = arith.constant 0 : index
    %c0_12 = arith.constant 0 : index
    %c0_13 = arith.constant 0 : index
    %4 = vector.load %arg5[%c0_11, %c0_12, %c0_13] : memref<2x8x8xf32, #tpu.memory_space<vmem>>, vector<2x8x8xf32>
    %c0_14 = arith.constant 0 : index
    %c0_15 = arith.constant 0 : index
    %c0_16 = arith.constant 0 : index
    %5 = vector.load %arg6[%c0_14, %c0_15, %c0_16] : memref<2x8x1xf32, #tpu.memory_space<vmem>>, vector<2x8x1xf32>
    %c0_17 = arith.constant 0 : index
    %c0_18 = arith.constant 0 : index
    %6 = vector.load %arg7[%c0_17, %c0_18] : memref<64x32xf32, #tpu.memory_space<vmem>>, vector<64x32xf32>
    %c0_19 = arith.constant 0 : index
    %c0_20 = arith.constant 0 : index
    %7 = vector.load %arg8[%c0_19, %c0_20] : memref<2x32xf32, #tpu.memory_space<vmem>>, vector<2x32xf32>
    %8 = vector.extract_strided_slice %6 {offsets = [0, 0], sizes = [32, 32], strides = [1, 1]} : vector<64x32xf32> to vector<32x32xf32>
    %9 = vector.extract_strided_slice %6 {offsets = [32, 0], sizes = [32, 32], strides = [1, 1]} : vector<64x32xf32> to vector<32x32xf32>
    %10 = vector.extract_strided_slice %7 {offsets = [0, 0], sizes = [1, 32], strides = [1, 1]} : vector<2x32xf32> to vector<1x32xf32>
    %11 = vector.extract_strided_slice %7 {offsets = [1, 0], sizes = [1, 32], strides = [1, 1]} : vector<2x32xf32> to vector<1x32xf32>
    %cst = arith.constant dense<0.000000e+00> : vector<2x8xf32>
    %12 = vector.multi_reduction <add>, %4, %cst [2] : vector<2x8x8xf32> to vector<2x8xf32>
    %13 = vector.shape_cast %12 : vector<2x8xf32> to vector<2x8x1xf32>
    %cst_21 = arith.constant 1.000000e+00 : f32
    %14 = vector.broadcast %cst_21 : f32 to vector<2x8x1xf32>
    %15 = arith.addf %13, %14 : vector<2x8x1xf32>
    %16 = tpu.reciprocal %15 {approx = true} : vector<2x8x1xf32> -> vector<2x8x1xf32>
    %17 = vector.shape_cast %0 : vector<2x8x32xf32> to vector<16x32xf32>
    %cst_22 = arith.constant dense<0.000000e+00> : vector<16x32xf32>
    %18 = tpu.matmul %17, %8, %cst_22 {dimension_numbers = #tpu.dot_dimension_numbers<[1], [0], [0], [1], [0, 0, 1, 1], [], []>} : vector<16x32xf32>, vector<32x32xf32>, vector<16x32xf32> -> vector<16x32xf32>
    %19 = vector.shape_cast %18 : vector<16x32xf32> to vector<2x8x32xf32>
    "tpu.trace_start"() <{level = 10 : i32, message = "bij,bjk->bik"}> : () -> ()
    %cst_23 = arith.constant dense<0.000000e+00> : vector<2x8x32xf32>
    %20 = tpu.matmul %4, %19, %cst_23 {dimension_numbers = #tpu.dot_dimension_numbers<[2], [1], [1], [2], [0, 0, 0, 1, 1, 2], [0], [0]>} : vector<2x8x8xf32>, vector<2x8x32xf32>, vector<2x8x32xf32> -> vector<2x8x32xf32>
    "tpu.trace_stop"() : () -> ()
    %21 = vector.broadcast %16 : vector<2x8x1xf32> to vector<2x8x32xf32>
    %22 = arith.mulf %20, %21 : vector<2x8x32xf32>
    %23 = vector.shape_cast %10 : vector<1x32xf32> to vector<1x1x32xf32>
    %24 = vector.broadcast %23 : vector<1x1x32xf32> to vector<2x8x32xf32>
    %25 = arith.addf %22, %24 : vector<2x8x32xf32>
    %cst_24 = arith.constant 0.000000e+00 : f32
    %26 = vector.broadcast %cst_24 : f32 to vector<2x8x32xf32>
    %27 = arith.maximumf %25, %26 : vector<2x8x32xf32>
    %28 = vector.shape_cast %27 : vector<2x8x32xf32> to vector<16x32xf32>
    %cst_25 = arith.constant dense<0.000000e+00> : vector<16x32xf32>
    %29 = tpu.matmul %28, %9, %cst_25 {dimension_numbers = #tpu.dot_dimension_numbers<[1], [0], [0], [1], [0, 0, 1, 1], [], []>} : vector<16x32xf32>, vector<32x32xf32>, vector<16x32xf32> -> vector<16x32xf32>
    %30 = vector.shape_cast %29 : vector<16x32xf32> to vector<2x8x32xf32>
    "tpu.trace_start"() <{level = 10 : i32, message = "bij,bjk->bik"}> : () -> ()
    %cst_26 = arith.constant dense<0.000000e+00> : vector<2x8x32xf32>
    %31 = tpu.matmul %4, %30, %cst_26 {dimension_numbers = #tpu.dot_dimension_numbers<[2], [1], [1], [2], [0, 0, 0, 1, 1, 2], [0], [0]>} : vector<2x8x8xf32>, vector<2x8x32xf32>, vector<2x8x32xf32> -> vector<2x8x32xf32>
    "tpu.trace_stop"() : () -> ()
    %32 = vector.broadcast %16 : vector<2x8x1xf32> to vector<2x8x32xf32>
    %33 = arith.mulf %31, %32 : vector<2x8x32xf32>
    %34 = vector.shape_cast %11 : vector<1x32xf32> to vector<1x1x32xf32>
    %35 = vector.broadcast %34 : vector<1x1x32xf32> to vector<2x8x32xf32>
    %36 = arith.addf %33, %35 : vector<2x8x32xf32>
    %cst_27 = arith.constant 0.000000e+00 : f32
    %37 = vector.broadcast %cst_27 : f32 to vector<2x8x32xf32>
    %38 = arith.maximumf %36, %37 : vector<2x8x32xf32>
    %39 = vector.broadcast %5 : vector<2x8x1xf32> to vector<2x8x32xf32>
    %40 = arith.mulf %39, %38 : vector<2x8x32xf32>
    "tpu.trace_start"() <{level = 10 : i32, message = "bik,bjk->bij"}> : () -> ()
    %cst_28 = arith.constant dense<0.000000e+00> : vector<2x8x8xf32>
    %41 = tpu.matmul %40, %0, %cst_28 {dimension_numbers = #tpu.dot_dimension_numbers<[2], [2], [1], [1], [0, 0, 0, 1, 1, 1], [0], [0]>} : vector<2x8x32xf32>, vector<2x8x32xf32>, vector<2x8x8xf32> -> vector<2x8x8xf32>
    "tpu.trace_stop"() : () -> ()
    %cst_29 = arith.constant dense<0.000000e+00> : vector<2x8xf32>
    %42 = vector.multi_reduction <add>, %41, %cst_29 [1] : vector<2x8x8xf32> to vector<2x8xf32>
    %43 = vector.shape_cast %42 : vector<2x8xf32> to vector<2x1x8xf32>
    %cst_30 = arith.constant dense<0xFF800000> : vector<2x1xf32>
    %44 = vector.multi_reduction <maximumf>, %43, %cst_30 [2] : vector<2x1x8xf32> to vector<2x1xf32>
    %45 = vector.shape_cast %44 : vector<2x1xf32> to vector<2x1x1xf32>
    %46 = vector.broadcast %45 : vector<2x1x1xf32> to vector<2x1x8xf32>
    %47 = arith.subf %43, %46 : vector<2x1x8xf32>
    %48 = math.exp %47 : vector<2x1x8xf32>
    %cst_31 = arith.constant dense<0.000000e+00> : vector<2x1xf32>
    %49 = vector.multi_reduction <add>, %48, %cst_31 [2] : vector<2x1x8xf32> to vector<2x1xf32>
    %50 = vector.shape_cast %49 : vector<2x1xf32> to vector<2x1x1xf32>
    %51 = tpu.reciprocal %50 {approx = true} : vector<2x1x1xf32> -> vector<2x1x1xf32>
    %52 = vector.broadcast %51 : vector<2x1x1xf32> to vector<2x1x8xf32>
    %53 = arith.mulf %48, %52 : vector<2x1x8xf32>
    "tpu.trace_start"() <{level = 10 : i32, message = "bij,bjk->bik"}> : () -> ()
    %cst_32 = arith.constant dense<0.000000e+00> : vector<2x1x32xf32>
    %54 = tpu.matmul %53, %0, %cst_32 {dimension_numbers = #tpu.dot_dimension_numbers<[2], [1], [1], [2], [0, 0, 0, 1, 1, 2], [0], [0]>} : vector<2x1x8xf32>, vector<2x8x32xf32>, vector<2x1x32xf32> -> vector<2x1x32xf32>
    "tpu.trace_stop"() : () -> ()
    %55 = vector.shape_cast %54 : vector<2x1x32xf32> to vector<2x32xf32>
    "tpu.trace_start"() <{level = 10 : i32, message = "bik,bjk->bij"}> : () -> ()
    %cst_33 = arith.constant dense<0.000000e+00> : vector<2x8x8xf32>
    %56 = tpu.matmul %0, %0, %cst_33 {dimension_numbers = #tpu.dot_dimension_numbers<[2], [2], [1], [1], [0, 0, 0, 1, 1, 1], [0], [0]>} : vector<2x8x32xf32>, vector<2x8x32xf32>, vector<2x8x8xf32> -> vector<2x8x8xf32>
    "tpu.trace_stop"() : () -> ()
    %cst_34 = arith.constant dense<0xFF800000> : vector<2x8xf32>
    %57 = vector.multi_reduction <maximumf>, %56, %cst_34 [2] : vector<2x8x8xf32> to vector<2x8xf32>
    %58 = vector.shape_cast %57 : vector<2x8xf32> to vector<2x8x1xf32>
    %59 = vector.broadcast %58 : vector<2x8x1xf32> to vector<2x8x8xf32>
    %60 = arith.subf %56, %59 : vector<2x8x8xf32>
    %61 = math.exp %60 : vector<2x8x8xf32>
    %cst_35 = arith.constant dense<0.000000e+00> : vector<2x8xf32>
    %62 = vector.multi_reduction <add>, %61, %cst_35 [2] : vector<2x8x8xf32> to vector<2x8xf32>
    %63 = vector.shape_cast %62 : vector<2x8xf32> to vector<2x8x1xf32>
    %64 = tpu.reciprocal %63 {approx = true} : vector<2x8x1xf32> -> vector<2x8x1xf32>
    %65 = vector.broadcast %64 : vector<2x8x1xf32> to vector<2x8x8xf32>
    %66 = arith.mulf %61, %65 : vector<2x8x8xf32>
    "tpu.trace_start"() <{level = 10 : i32, message = "bij,bjk->bik"}> : () -> ()
    %cst_36 = arith.constant dense<0.000000e+00> : vector<2x8x32xf32>
    %67 = tpu.matmul %66, %0, %cst_36 {dimension_numbers = #tpu.dot_dimension_numbers<[2], [1], [1], [2], [0, 0, 0, 1, 1, 2], [0], [0]>} : vector<2x8x8xf32>, vector<2x8x32xf32>, vector<2x8x32xf32> -> vector<2x8x32xf32>
    "tpu.trace_stop"() : () -> ()
    "tpu.trace_start"() <{level = 10 : i32, message = "bik,bjk->bij"}> : () -> ()
    %cst_37 = arith.constant dense<0.000000e+00> : vector<2x8x8xf32>
    %68 = tpu.matmul %1, %0, %cst_37 {dimension_numbers = #tpu.dot_dimension_numbers<[2], [2], [1], [1], [0, 0, 0, 1, 1, 1], [0], [0]>} : vector<2x8x32xf32>, vector<2x8x32xf32>, vector<2x8x8xf32> -> vector<2x8x8xf32>
    "tpu.trace_stop"() : () -> ()
    %cst_38 = arith.constant dense<0xFF800000> : vector<2x8xf32>
    %69 = vector.multi_reduction <maximumf>, %68, %cst_38 [2] : vector<2x8x8xf32> to vector<2x8xf32>
    %70 = vector.shape_cast %69 : vector<2x8xf32> to vector<2x8x1xf32>
    %71 = vector.broadcast %70 : vector<2x8x1xf32> to vector<2x8x8xf32>
    %72 = arith.subf %68, %71 : vector<2x8x8xf32>
    %73 = math.exp %72 : vector<2x8x8xf32>
    %cst_39 = arith.constant dense<0.000000e+00> : vector<2x8xf32>
    %74 = vector.multi_reduction <add>, %73, %cst_39 [2] : vector<2x8x8xf32> to vector<2x8xf32>
    %75 = vector.shape_cast %74 : vector<2x8xf32> to vector<2x8x1xf32>
    %76 = tpu.reciprocal %75 {approx = true} : vector<2x8x1xf32> -> vector<2x8x1xf32>
    %77 = vector.broadcast %76 : vector<2x8x1xf32> to vector<2x8x8xf32>
    %78 = arith.mulf %73, %77 : vector<2x8x8xf32>
    "tpu.trace_start"() <{level = 10 : i32, message = "bij,bjk->bik"}> : () -> ()
    %cst_40 = arith.constant dense<0.000000e+00> : vector<2x8x32xf32>
    %79 = tpu.matmul %78, %67, %cst_40 {dimension_numbers = #tpu.dot_dimension_numbers<[2], [1], [1], [2], [0, 0, 0, 1, 1, 2], [0], [0]>} : vector<2x8x8xf32>, vector<2x8x32xf32>, vector<2x8x32xf32> -> vector<2x8x32xf32>
    "tpu.trace_stop"() : () -> ()
    %cst_41 = arith.constant dense<0xFF800000> : vector<2x32xf32>
    %80 = vector.multi_reduction <maximumf>, %79, %cst_41 [1] : vector<2x8x32xf32> to vector<2x32xf32>
    "tpu.trace_start"() <{level = 10 : i32, message = "bik,bjk->bij"}> : () -> ()
    %cst_42 = arith.constant dense<0.000000e+00> : vector<2x8x8xf32>
    %81 = tpu.matmul %3, %2, %cst_42 {dimension_numbers = #tpu.dot_dimension_numbers<[2], [2], [1], [1], [0, 0, 0, 1, 1, 1], [0], [0]>} : vector<2x8x32xf32>, vector<2x8x32xf32>, vector<2x8x8xf32> -> vector<2x8x8xf32>
    "tpu.trace_stop"() : () -> ()
    %82 = arith.addf %81, %68 : vector<2x8x8xf32>
    %cst_43 = arith.constant dense<0xFF800000> : vector<2x8xf32>
    %83 = vector.multi_reduction <maximumf>, %82, %cst_43 [2] : vector<2x8x8xf32> to vector<2x8xf32>
    %84 = vector.shape_cast %83 : vector<2x8xf32> to vector<2x8x1xf32>
    %85 = vector.broadcast %84 : vector<2x8x1xf32> to vector<2x8x8xf32>
    %86 = arith.subf %82, %85 : vector<2x8x8xf32>
    %87 = math.exp %86 : vector<2x8x8xf32>
    %cst_44 = arith.constant dense<0.000000e+00> : vector<2x8xf32>
    %88 = vector.multi_reduction <add>, %87, %cst_44 [2] : vector<2x8x8xf32> to vector<2x8xf32>
    %89 = vector.shape_cast %88 : vector<2x8xf32> to vector<2x8x1xf32>
    %90 = tpu.reciprocal %89 {approx = true} : vector<2x8x1xf32> -> vector<2x8x1xf32>
    %91 = vector.broadcast %90 : vector<2x8x1xf32> to vector<2x8x8xf32>
    %92 = arith.mulf %87, %91 : vector<2x8x8xf32>
    "tpu.trace_start"() <{level = 10 : i32, message = "bij,bjk->bik"}> : () -> ()
    %cst_45 = arith.constant dense<0.000000e+00> : vector<2x8x32xf32>
    %93 = tpu.matmul %92, %2, %cst_45 {dimension_numbers = #tpu.dot_dimension_numbers<[2], [1], [1], [2], [0, 0, 0, 1, 1, 2], [0], [0]>} : vector<2x8x8xf32>, vector<2x8x32xf32>, vector<2x8x32xf32> -> vector<2x8x32xf32>
    "tpu.trace_stop"() : () -> ()
    %cst_46 = arith.constant dense<0xFF800000> : vector<2x32xf32>
    %94 = vector.multi_reduction <maximumf>, %93, %cst_46 [1] : vector<2x8x32xf32> to vector<2x32xf32>
    "tpu.trace_start"() <{level = 10 : i32, message = "bij,bjk->bik"}> : () -> ()
    %cst_47 = arith.constant dense<0.000000e+00> : vector<2x8x32xf32>
    %95 = tpu.matmul %92, %0, %cst_47 {dimension_numbers = #tpu.dot_dimension_numbers<[2], [1], [1], [2], [0, 0, 0, 1, 1, 2], [0], [0]>} : vector<2x8x8xf32>, vector<2x8x32xf32>, vector<2x8x32xf32> -> vector<2x8x32xf32>
    "tpu.trace_stop"() : () -> ()
    %cst_48 = arith.constant dense<0xFF800000> : vector<2x32xf32>
    %96 = vector.multi_reduction <maximumf>, %95, %cst_48 [1] : vector<2x8x32xf32> to vector<2x32xf32>
    %c0_49 = arith.constant 0 : index
    %c0_50 = arith.constant 0 : index
    %97 = vector.load %arg9[%c0_49, %c0_50] : memref<128x128xf32, #tpu.memory_space<vmem>>, vector<128x128xf32>
    %98 = vector.extract_strided_slice %97 {offsets = [0, 0], sizes = [32, 128], strides = [1, 1]} : vector<128x128xf32> to vector<32x128xf32>
    %cst_51 = arith.constant dense<0.000000e+00> : vector<2x128xf32>
    %99 = tpu.matmul %55, %98, %cst_51 {dimension_numbers = #tpu.dot_dimension_numbers<[1], [0], [0], [1], [0, 0, 1, 1], [], []>} : vector<2x32xf32>, vector<32x128xf32>, vector<2x128xf32> -> vector<2x128xf32>
    %100 = vector.extract_strided_slice %97 {offsets = [32, 0], sizes = [32, 128], strides = [1, 1]} : vector<128x128xf32> to vector<32x128xf32>
    %cst_52 = arith.constant dense<0.000000e+00> : vector<2x128xf32>
    %101 = tpu.matmul %80, %100, %cst_52 {dimension_numbers = #tpu.dot_dimension_numbers<[1], [0], [0], [1], [0, 0, 1, 1], [], []>} : vector<2x32xf32>, vector<32x128xf32>, vector<2x128xf32> -> vector<2x128xf32>
    %102 = arith.addf %99, %101 : vector<2x128xf32>
    %103 = vector.extract_strided_slice %97 {offsets = [64, 0], sizes = [32, 128], strides = [1, 1]} : vector<128x128xf32> to vector<32x128xf32>
    %cst_53 = arith.constant dense<0.000000e+00> : vector<2x128xf32>
    %104 = tpu.matmul %94, %103, %cst_53 {dimension_numbers = #tpu.dot_dimension_numbers<[1], [0], [0], [1], [0, 0, 1, 1], [], []>} : vector<2x32xf32>, vector<32x128xf32>, vector<2x128xf32> -> vector<2x128xf32>
    %105 = arith.addf %102, %104 : vector<2x128xf32>
    %106 = vector.extract_strided_slice %97 {offsets = [96, 0], sizes = [32, 128], strides = [1, 1]} : vector<128x128xf32> to vector<32x128xf32>
    %cst_54 = arith.constant dense<0.000000e+00> : vector<2x128xf32>
    %107 = tpu.matmul %96, %106, %cst_54 {dimension_numbers = #tpu.dot_dimension_numbers<[1], [0], [0], [1], [0, 0, 1, 1], [], []>} : vector<2x32xf32>, vector<32x128xf32>, vector<2x128xf32> -> vector<2x128xf32>
    %108 = arith.addf %105, %107 : vector<2x128xf32>
    %c0_55 = arith.constant 0 : index
    %c0_56 = arith.constant 0 : index
    %109 = vector.load %arg10[%c0_55, %c0_56] : memref<1x128xf32, #tpu.memory_space<vmem>>, vector<1x128xf32>
    %110 = vector.broadcast %109 : vector<1x128xf32> to vector<2x128xf32>
    %111 = arith.addf %108, %110 : vector<2x128xf32>
    %c0_57 = arith.constant 0 : index
    %c0_58 = arith.constant 0 : index
    %112 = vector.load %arg11[%c0_57, %c0_58] : memref<2x128xf32, #tpu.memory_space<vmem>>, vector<2x128xf32>
    tpu.vector_store %arg11[%c0_57, %c0_58], %111 {strides = array<i32>} : memref<2x128xf32, #tpu.memory_space<vmem>>, vector<2x128xf32>,
    return
  }
  func.func @transform_0(%arg0: i32) -> (i32, i32, i32) {
    %c0_i32 = arith.constant 0 : i32
    %c0_i32_0 = arith.constant 0 : i32
    %c0_i32_1 = arith.constant 0 : i32
    return %arg0, %c0_i32, %c0_i32_0 : i32, i32, i32
  }
  func.func @transform_1(%arg0: i32) -> (i32, i32, i32) {
    %c0_i32 = arith.constant 0 : i32
    %c0_i32_0 = arith.constant 0 : i32
    %c0_i32_1 = arith.constant 0 : i32
    return %arg0, %c0_i32, %c0_i32_0 : i32, i32, i32
  }
  func.func @transform_2(%arg0: i32) -> (i32, i32, i32) {
    %c0_i32 = arith.constant 0 : i32
    %c0_i32_0 = arith.constant 0 : i32
    %c0_i32_1 = arith.constant 0 : i32
    return %arg0, %c0_i32, %c0_i32_0 : i32, i32, i32
  }
  func.func @transform_3(%arg0: i32) -> (i32, i32, i32) {
    %c0_i32 = arith.constant 0 : i32
    %c0_i32_0 = arith.constant 0 : i32
    %c0_i32_1 = arith.constant 0 : i32
    return %arg0, %c0_i32, %c0_i32_0 : i32, i32, i32
  }
  func.func @transform_4(%arg0: i32) -> (i32, i32, i32) {
    %c0_i32 = arith.constant 0 : i32
    %c0_i32_0 = arith.constant 0 : i32
    %c0_i32_1 = arith.constant 0 : i32
    return %arg0, %c0_i32, %c0_i32_0 : i32, i32, i32
  }
  func.func @transform_5(%arg0: i32) -> (i32, i32, i32) {
    %c0_i32 = arith.constant 0 : i32
    %c0_i32_0 = arith.constant 0 : i32
    %c0_i32_1 = arith.constant 0 : i32
    return %arg0, %c0_i32, %c0_i32_0 : i32, i32, i32
  }
  func.func @transform_6(%arg0: i32) -> (i32, i32) {
    %c0_i32 = arith.constant 0 : i32
    %c0_i32_0 = arith.constant 0 : i32
    %c0_i32_1 = arith.constant 0 : i32
    return %c0_i32, %c0_i32_0 : i32, i32
  }
  func.func @transform_7(%arg0: i32) -> (i32, i32) {
    %c0_i32 = arith.constant 0 : i32
    %c0_i32_0 = arith.constant 0 : i32
    %c0_i32_1 = arith.constant 0 : i32
    return %c0_i32, %c0_i32_0 : i32, i32
  }
  func.func @transform_8(%arg0: i32) -> (i32, i32) {
    %c0_i32 = arith.constant 0 : i32
    %c0_i32_0 = arith.constant 0 : i32
    %c0_i32_1 = arith.constant 0 : i32
    return %c0_i32, %c0_i32_0 : i32, i32
  }
  func.func @transform_9(%arg0: i32) -> (i32, i32) {
    %c0_i32 = arith.constant 0 : i32
    %c0_i32_0 = arith.constant 0 : i32
    %c0_i32_1 = arith.constant 0 : i32
    return %c0_i32, %c0_i32_0 : i32, i32
  }
  func.func @transform_10(%arg0: i32) -> (i32, i32) {
    %c0_i32 = arith.constant 0 : i32
    %c0_i32_0 = arith.constant 0 : i32
    return %arg0, %c0_i32 : i32, i32
  }
}

</mosaic_0001>

<bundles_post_ra>
// kernel: tpu_custom_call.1
= control target key start
LH: loop header
LB: loop body
LE: loop exit
PB: predicated region body
PF: predicated region fallthrough
CT: control target
= control target key end

     0   :  { %15 = vsyncpa [#allocation3], 0  ;;  %s1312_s0 = inlined_call_operand.vmem [shape: f32[2,8,32], index: 0, kind: input, shape index: {}]   ;;  %s1313_s1 = inlined_call_operand.vmem [shape: f32[2,8,32], index: 1, kind: input, shape index: {}]   ;;  %s1314_s2 = inlined_call_operand.vmem [shape: f32[2,8,32], index: 2, kind: input, shape index: {}]   ;;  %s1315_s3 = inlined_call_operand.vmem [shape: f32[2,8,32], index: 3, kind: input, shape index: {}]   ;;  %s1316_s4 = inlined_call_operand.vmem [shape: f32[2,8,8], index: 4, kind: input, shape index: {}]   ;;  %s1317_s5 = inlined_call_operand.vmem [shape: f32[2,8,1], index: 5, kind: input, shape index: {}]   ;;  %s1318_s6 = inlined_call_operand.vmem [shape: f32[64,32], index: 6, kind: input, shape index: {}]   ;;  %s1319_s7 = inlined_call_operand.vmem [shape: f32[2,32], index: 7, kind: input, shape index: {}]   ;;  %s1320_s8 = inlined_call_operand.hbm [shape: f32[128,128], index: 8, kind: input, shape index: {}]   ;;  %s1321_s9 = inlined_call_operand.vmem [shape: f32[1,128], index: 9, kind: input, shape index: {}]   ;;  %s1322_s10 = inlined_call_operand.hbm [shape: f32[2,128], index: 10, kind: output, shape index: {}]  }
   0x1   :  { %16 = vsyncpa [#allocation4], 0  ;;  %s37_s15 = sshll.u32 %s1320_s8, 4  ;;  %s1084_s16 = smov [#allocation2]   ;;  %s38_s15 = int_to_ptr.hbm [resolvable:$true] %s37_s15 }
   0x2   :  { %s39_s17 = sshll.u32 %s1084_s16, 4  ;;  %s1085_s18 = smov 128   ;;  %s40_s17 = int_to_ptr.vmem [resolvable:$true] %s39_s17 }
   0x3   :  { %s1086_s19 = smov 8  }
   0x4   :  { %45 = dma.hbm_to_vmem [thread:$0]  %s38_s15, 2048, %s40_s17, [#allocation3], %s1085_s18, %s1085_s18, %s1086_s19  }
   0x5   :  { %1080 = dma.done.wait [#allocation3], 2048  }
   0x6   :  { %1081 = vsyncadd [#allocation3], 4294965248  ;;  %v67_v0 = vld [vmem:[%s1318_s6 + $0x18] sm:$0xff]  ;;  %v66_v1 = vld [vmem:[%s1318_s6 + $0x10] sm:$0xff]  ;;  %vm84_vm0 = vcmask 261120   ;;  %vm73_vm1 = vcmask 64512  }
   0x7   :  { %103 = vmatpush.msra.mxu0 %v67_v0  ;;  %v65_v2 = vld [vmem:[%s1318_s6 + $0x8] sm:$0xff]  ;;  %v64_v3 = vld [vmem:[%s1318_s6] sm:$0xff]  ;;  %v71_v12 = vld [vmem:[%s1318_s6 + $0x38] sm:$0xff]  ;;  %v1087_v33 = vmov 0   ;;  %vm825_vm2 = vcmask 1041409   ;;  %s940_s17 = sshll.u32 %s1322_s10, 4  ;;  %s941_s17 = int_to_ptr.hbm [resolvable:$true] %s940_s17 }
   0x8   :  { %v1162_v4 = vld [vmem:[%s1312_s0] sm:$0xff]  ;;  %v1171_v5 = vld [vmem:[%s1312_s0 + $0x8] sm:$0xff]  ;;  %185 = vmatpush.msra.mxu3 %v71_v12  ;;  %v70_v13 = vld [vmem:[%s1318_s6 + $0x30] sm:$0xff]  ;;  %993 = vset.pattern.permute.xlu1 %v1087_v33 }
   0x9   :  { %104 = vmatpush.msra.mxu0 %v66_v1  ;;  %v60_v6 = vld [vmem:[%s1316_s4] sm:$0xff]  ;;  %v61_v8 = vld [vmem:[%s1316_s4 + $0x8] sm:$0xff]  ;;  %994 = vset.pattern.permute.xlu0 %v1087_v33 }
   0xa   :  { %v74_v7 = vsel %vm73_vm1, %v60_v6, 0.0  ;;  %v77_v9 = vsel %vm73_vm1, %v61_v8, 0.0  ;;  %186 = vmatpush.msra.mxu3 %v70_v13  ;;  %v69_v14 = vld [vmem:[%s1318_s6 + $0x28] sm:$0xff]  ;;  %v68_v15 = vld [vmem:[%s1318_s6 + $0x20] sm:$0xff] }
   0xb   :  { %105 = vmatpush.msra.mxu0 %v65_v2  ;;  %75 = vadd.xlane.f32.xlu0 %v74_v7  ;;  %v72_v18 = vld [vmem:[%s1319_s7] sm:$0x3]  ;;  %v63_v32 = vld [vmem:[%s1317_s5 + $0x8] sm:$0xff] }
   0xc   :  { %187 = vmatpush.msra.mxu3 %v69_v14  ;;  %v162_v20 = vperm.slane %v72_v18, 0  ;;  %250 = vperm.xlu1 %993, %v63_v32   ;;  %v62_v34 = vld [vmem:[%s1317_s5] sm:$0xff]  ;;  %v238_v38 = vperm.slane %v72_v18, 1  ;;  %v55_v58 = vld [vmem:[%s1313_s1 + $0x8] sm:$0xff] }
   0xd   :  { %106 = vmatpush.msra.mxu0 %v64_v3  ;;  %v1240_v62 = vld [vmem:[%s1314_s2 + $0x8] sm:$0xff]  ;;  %v54_v0 = vld [vmem:[%s1313_s1] sm:$0xff] }
   0xe   :  { %950 = vmatmul.msk.f32.vlgmr.msra.gmra.mxu0 %vm84_vm0, %v1162_v4  ;;  %188 = vmatpush.msra.mxu3 %v68_v15  ;;  %v59_v63 = vld [vmem:[%s1315_s3 + $0x8] sm:$0xff]  ;;  %v1254_v1 = vld [vmem:[%s1314_s2] sm:$0xff] }
   0xf   :  { %355 = vmatpush.msrb.mxu0 %v1162_v4  ;;  %v58_v2 = vld [vmem:[%s1315_s3] sm:$0xff]  ;;  %s1088_s3 = smov [#allocation5]  }
  0x10   :  { %378 = vmatpush.msrb.mxu3 %v1171_v5  ;;  %s938_s0 = sshll.u32 %s1088_s3, 4  ;;  %s939_s0 = int_to_ptr.vmem [resolvable:$true] %s938_s0 }
  0x11   :  { %463 = vmatpush.msra.mxu0 %v1162_v4 }
  0x13   :  { %78 = vadd.xlane.f32.xlu0 %v77_v9 }
  0x14   :  { %245 = vperm.xlu1 %993, %v62_v34  }
  0x16   :  { %951 = vmatmul.msk.f32.gmra.mxu0 %vm84_vm0, %v1171_v5 }
  0x7e   :  { %v76_v16 = vpop.xlane.xlu0 %75  ;;  %v251_v37 = vpop.permute.xlu1 %250 }
  0x7f   :  { %v80_v17 = vadd.f32 1.0, %v76_v16 }
  0x81   :  { %996 = vrcp.f32 %v80_v17 }
  0x86   :  { %v79_v21 = vpop.xlane.xlu0 %78  ;;  %v246_v42 = vpop.permute.xlu1 %245 }
  0x87   :  { %v997_v19 = vpop.eup %996  ;;  %v81_v24 = vadd.f32 1.0, %v79_v21 }
  0x89   :  { %998 = vrcp.f32 %v81_v24 }
  0x8b   :  { %v108_v10 = vpop.f32.mrf.mxu0 }
  0x8c   :  { %132 = vmatpush.msra.mxu1 %v108_v10 }
  0x8d   :  { %952 = vmatmul.msk.f32.vlgmr.msra.gmra.mxu1 %vm73_vm1, %v60_v6 }
  0x8f   :  { %v999_v27 = vpop.eup %998 }
  0x93   :  { %v111_v11 = vpop.f32.mrf.mxu0 }
  0x94   :  { %155 = vmatpush.msra.mxu2 %v111_v11 }
  0x95   :  { %953 = vmatmul.msk.f32.vlgmr.msra.gmra.mxu2 %vm73_vm1, %v61_v8 }
 0x10a   :  { %v134_v22 = vpop.f32.mrf.mxu1 }
 0x10b   :  { %v160_v23 = vmul.f32 %v997_v19, %v134_v22 }
 0x10d   :  { %v163_v25 = vadd.f32 %v162_v20, %v160_v23 }
 0x10f   :  { %v165_v26 = vmax.f32 %v163_v25, 0.0 }
 0x111   :  { %954 = vmatmul.msk.f32.vlgmr.msra.gmra.mxu3 %vm84_vm0, %v165_v26 }
 0x112   :  { %486 = vmatpush.msra.mxu3 %v1171_v5 }
 0x118   :  { %v157_v28 = vpop.f32.mrf.mxu2 }
 0x119   :  { %v161_v29 = vmul.f32 %v999_v27, %v157_v28 }
 0x11b   :  { %v164_v30 = vadd.f32 %v162_v20, %v161_v29 }
 0x11d   :  { %v166_v31 = vmax.f32 %v164_v30, 0.0 }
 0x11f   :  { %955 = vmatmul.msk.f32.gmra.mxu3 %vm84_vm0, %v166_v31 }
 0x194   :  { %v190_v35 = vpop.f32.mrf.mxu3 }
 0x195   :  { %211 = vmatpush.msrb.mxu1 %v190_v35 }
 0x196   :  { %956 = vmatmul.msk.f32.vlgmr.msrb.gmra.mxu1 %vm73_vm1, %v60_v6 }
 0x197   :  { %958 = vmatpush.xpose.msk.msra.mxu1 %vm84_vm0, %v1162_v4 }
 0x19b   :  { %964 = vmatpush.xpose.msk.msrb.mxu1 %vm84_vm0, %v1162_v4 }
 0x1a2   :  { %v193_v36 = vpop.f32.mrf.mxu3 }
 0x1a3   :  { %231 = vmatpush.msrb.mxu2 %v193_v36 }
 0x1a4   :  { %957 = vmatmul.msk.f32.vlgmr.msrb.gmra.mxu2 %vm73_vm1, %v61_v8 }
 0x1a5   :  { %960 = vmatpush.xpose.msk.msra.mxu2 %vm84_vm0, %v1171_v5 }
 0x1a9   :  { %966 = vmatpush.xpose.msk.msrb.mxu2 %vm84_vm0, %v1171_v5 }
 0x213   :  { %v213_v39 = vpop.f32.mrf.mxu1 }
 0x214   :  { %v236_v40 = vmul.f32 %v997_v19, %v213_v39 }
 0x216   :  { %v239_v41 = vadd.f32 %v238_v38, %v236_v40 }
 0x218   :  { %v241_v43 = vmax.f32 %v239_v41, 0.0 }
 0x21a   :  { %v253_v44 = vmul.f32 %v246_v42, %v241_v43 }
 0x21c   :  { %959 = vmatmul.msk.f32.vlgmr.msra.gmra.mxu1 %vm84_vm0, %v253_v44 }
 0x21d   :  { %970 = vmatpush.xpose.msk.msra.mxu1 %vm84_vm0, %v1162_v4 }
 0x224   :  { %965 = vmatmul.msk.f32.vlgmr.msrb.gmra.mxu1 %vm84_vm0, %v1162_v4 }
 0x225   :  { %976 = vmatpush.xpose.msk.msrb.mxu1 %vm84_vm0, %v1254_v1 }
 0x227   :  { %v233_v45 = vpop.f32.mrf.mxu2 }
 0x228   :  { %v237_v46 = vmul.f32 %v999_v27, %v233_v45 }
 0x22a   :  { %v240_v47 = vadd.f32 %v238_v38, %v237_v46 }
 0x22c   :  { %v242_v48 = vmax.f32 %v240_v47, 0.0  ;;  %971 = vmatmul.msk.f32.vlgmr.msra.gmra.mxu1 %vm84_vm0, %v54_v0 }
 0x22d   :  { %768 = vmatpush.msra.mxu1 %v1162_v4 }
 0x22e   :  { %v254_v49 = vmul.f32 %v251_v37, %v242_v48 }
 0x230   :  { %961 = vmatmul.msk.f32.vlgmr.msra.gmra.mxu2 %vm84_vm0, %v254_v49 }
 0x231   :  { %972 = vmatpush.xpose.msk.msra.mxu2 %vm84_vm0, %v1171_v5 }
 0x234   :  { %977 = vmatmul.msk.f32.vlgmr.msrb.gmra.mxu1 %vm84_vm0, %v58_v2 }
 0x238   :  { %967 = vmatmul.msk.f32.vlgmr.msrb.gmra.mxu2 %vm84_vm0, %v1171_v5 }
 0x239   :  { %978 = vmatpush.xpose.msk.msrb.mxu2 %vm84_vm0, %v1240_v62 }
 0x240   :  { %973 = vmatmul.msk.f32.vlgmr.msra.gmra.mxu2 %vm84_vm0, %v55_v58 }
 0x241   :  { %788 = vmatpush.msra.mxu2 %v1171_v5 }
 0x248   :  { %979 = vmatmul.msk.f32.vlgmr.msrb.gmra.mxu2 %vm84_vm0, %v59_v63 }
 0x299   :  { %v275_v50 = vpop.f32.mrf.mxu1 }
 0x29a   :  { %v301_v51 = vsel %vm73_vm1, %v275_v50, 0.0 }
 0x29b   :  { %v302_v52 = vrot.slane %v301_v51, 4 }
 0x29d   :  { %v303_v53 = vadd.f32 %v302_v52, %v301_v51 }
 0x29f   :  { %v304_v54 = vrot.slane %v303_v53, 2 }
 0x2a1   :  { %v305_v55 = vadd.f32 %v304_v54, %v303_v53  ;;  %v400_v56 = vpop.f32.mrf.mxu1 }
 0x2a2   :  { %v423_v57 = vsel %vm73_vm1, %v400_v56, -inf }
 0x2a3   :  { %424 = vmax.xlane.f32.xlu1 %v423_v57  ;;  %v306_v59 = vrot.slane %v305_v55, 1 }
 0x2a5   :  { %v307_v60 = vadd.f32 %v306_v59, %v305_v55 }
 0x2a7   :  { %v315_v61 = vsel %vm73_vm1, %v307_v60, -inf }
 0x2a8   :  { %316 = vmax.xlane.f32.xlu0 %v315_v61 }
 0x2a9   :  { %v511_v34 = vpop.f32.mrf.mxu1 }
 0x2aa   :  { %v537_v39 = vsel %vm73_vm1, %v511_v34, -inf }
 0x2b1   :  { %v642_v41 = vpop.f32.mrf.mxu1 }
 0x2b2   :  { %v643_v42 = vadd.f32 %v642_v41, %v511_v34  ;;  %v821_v41 = vld [vmem:[#allocation2 + $0x70] sm:$0xff] }
 0x2b3   :  { %v298_v3 = vpop.f32.mrf.mxu2 }
 0x2b4   :  { %v308_v5 = vsel %vm73_vm1, %v298_v3, 0.0  ;;  %v671_v43 = vsel %vm73_vm1, %v643_v42, -inf }
 0x2b5   :  { %v309_v6 = vrot.slane %v308_v5, 4 }
 0x2b7   :  { %v310_v7 = vadd.f32 %v309_v6, %v308_v5 }
 0x2b9   :  { %v311_v8 = vrot.slane %v310_v7, 2 }
 0x2bb   :  { %v312_v9 = vadd.f32 %v311_v8, %v310_v7  ;;  %v420_v13 = vpop.f32.mrf.mxu2 }
 0x2bc   :  { %v426_v4 = vsel %vm73_vm1, %v420_v13, -inf }
 0x2bd   :  { %v313_v10 = vrot.slane %v312_v9, 1 }
 0x2bf   :  { %v314_v11 = vadd.f32 %v313_v10, %v312_v9 }
 0x2c1   :  { %v318_v12 = vsel %vm73_vm1, %v314_v11, -inf }
 0x2c2   :  { %319 = vmax.xlane.f32.xlu2 %v318_v12 }
 0x2c3   :  { %v534_v30 = vpop.f32.mrf.mxu2 }
 0x2c4   :  { %v540_v35 = vsel %vm73_vm1, %v534_v30, -inf }
 0x2ca   :  { %427 = vmax.xlane.f32.xlu2 %v426_v4 }
 0x2cb   :  { %v668_v37 = vpop.f32.mrf.mxu2 }
 0x2cc   :  { %v669_v38 = vadd.f32 %v668_v37, %v534_v30  ;;  %v811_v37 = vld [vmem:[#allocation2 + $0x20] sm:$0xff] }
 0x2ce   :  { %v674_v40 = vsel %vm73_vm1, %v669_v38, -inf }
 0x316   :  { %v425_v20 = vpop.xlane.xlu1 %424 }
 0x317   :  { %v429_v24 = vsub.f32 %v400_v56, %v425_v20 }
 0x319   :  { %v431_v27 = vmul.f32 1.442695, %v429_v24  ;;  %v809_v24 = vld [vmem:[#allocation2 + $0x10] sm:$0xff] }
 0x31b   :  { %v317_v14 = vpop.xlane.xlu0 %316 }
 0x31c   :  { %v321_v17 = vsub.f32 %v307_v60, %v317_v14 }
 0x31e   :  { %v323_v19 = vmul.f32 1.442695, %v321_v17 }
 0x335   :  { %v320_v15 = vpop.xlane.xlu2 %319 }
 0x336   :  { %v322_v16 = vsub.f32 %v314_v11, %v320_v15 }
 0x338   :  { %v325_v18 = vmul.f32 1.442695, %v322_v16 }
 0x33a   :  { %1000 = vpow2.f32 %v325_v18 }
 0x33b   :  { %1002 = vpow2.f32 %v323_v19 }
 0x33d   :  { %v428_v21 = vpop.xlane.xlu2 %427 }
 0x33e   :  { %v430_v22 = vsub.f32 %v420_v13, %v428_v21 }
 0x340   :  { %v1001_v23 = vpop.eup %1000  ;;  %v433_v25 = vmul.f32 1.442695, %v430_v22  ;;  %v810_v22 = vld [vmem:[#allocation2 + $0x18] sm:$0xff] }
 0x341   :  { %v330_v26 = vsel %vm73_vm1, %v1001_v23, 0.0  ;;  %v1003_v28 = vpop.eup %1002 }
 0x342   :  { %1004 = vpow2.f32 %v433_v25  ;;  %331 = vadd.xlane.f32.xlu2 %v330_v26  ;;  %v327_v31 = vsel %vm73_vm1, %v1003_v28, 0.0  ;;  %v808_v25 = vld [vmem:[#allocation2 + $0x8] sm:$0xff]  ;;  %v807_v26 = vld [vmem:[#allocation2] sm:$0xff] }
 0x343   :  { %1006 = vpow2.f32 %v431_v27 }
 0x348   :  { %v1005_v29 = vpop.eup %1004 }
 0x349   :  { %v438_v32 = vsel %vm73_vm1, %v1005_v29, 0.0  ;;  %v1007_v33 = vpop.eup %1006 }
 0x34a   :  { %328 = vadd.xlane.f32.xlu2 %v327_v31  ;;  %439 = vadd.xlane.f32.xlu0 %v438_v32  ;;  %v435_v36 = vsel %vm73_vm1, %v1007_v33, 0.0 }
 0x352   :  { %541 = vmax.xlane.f32.xlu2 %v540_v35  ;;  %436 = vadd.xlane.f32.xlu0 %v435_v36  ;;  %v813_v35 = vld [vmem:[#allocation2 + $0x30] sm:$0xff]  ;;  %v812_v36 = vld [vmem:[#allocation2 + $0x28] sm:$0xff] }
 0x35a   :  { %538 = vmax.xlane.f32.xlu2 %v537_v39  ;;  %675 = vmax.xlane.f32.xlu0 %v674_v40  ;;  %v822_v39 = vld [vmem:[#allocation2 + $0x78] sm:$0xff]  ;;  %v817_v40 = vld [vmem:[#allocation2 + $0x50] sm:$0xff] }
 0x35b   :  { %918 = vmatpush.msrb.mxu2 %v822_v39 }
 0x35d   :  { %919 = vmatpush.msrb.mxu2 %v821_v41 }
 0x362   :  { %672 = vmax.xlane.f32.xlu0 %v671_v43  ;;  %v820_v43 = vld [vmem:[#allocation2 + $0x68] sm:$0xff] }
 0x363   :  { %920 = vmatpush.msrb.mxu2 %v820_v43 }
 0x3b5   :  { %v332_v44 = vpop.xlane.xlu2 %331 }
 0x3b6   :  { %1008 = vrcp.f32 %v332_v44  ;;  %v815_v44 = vld [vmem:[#allocation2 + $0x40] sm:$0xff] }
 0x3bc   :  { %v1009_v45 = vpop.eup %1008 }
 0x3bd   :  { %v440_v46 = vpop.xlane.xlu0 %439  ;;  %v329_v47 = vpop.xlane.xlu2 %328  ;;  %v336_v48 = vmul.f32 %v1009_v45, %v1001_v23  ;;  %v819_v45 = vld [vmem:[#allocation2 + $0x60] sm:$0xff] }
 0x3be   :  { %1010 = vrcp.f32 %v440_v46  ;;  %921 = vmatpush.msrb.mxu2 %v819_v45 }
 0x3bf   :  { %1012 = vrcp.f32 %v329_v47  ;;  %963 = vmatmul.msk.f32.vlgmr.msrb.gmra.mxu3 %vm73_vm1, %v336_v48 }
 0x3c4   :  { %v1011_v49 = vpop.eup %1010 }
 0x3c5   :  { %v1013_v50 = vpop.eup %1012  ;;  %v444_v51 = vmul.f32 %v1011_v49, %v1005_v29  ;;  %v437_v52 = vpop.xlane.xlu0 %436 }
 0x3c6   :  { %v542_v53 = vpop.xlane.xlu2 %541  ;;  %1014 = vrcp.f32 %v437_v52  ;;  %v335_v55 = vmul.f32 %v1013_v50, %v1003_v28 }
 0x3c7   :  { %v544_v54 = vsub.f32 %v534_v30, %v542_v53  ;;  %969 = vmatmul.msk.f32.vlgmr.msra.gmra.mxu3 %vm73_vm1, %v444_v51 }
 0x3c8   :  { %962 = vmatmul.msk.f32.vlgmr.msrb.gmra.mxu0 %vm73_vm1, %v335_v55 }
 0x3c9   :  { %v547_v56 = vmul.f32 1.442695, %v544_v54 }
 0x3cb   :  { %1016 = vpow2.f32 %v547_v56 }
 0x3cc   :  { %v1015_v57 = vpop.eup %1014 }
 0x3cd   :  { %v443_v58 = vmul.f32 %v1015_v57, %v1007_v33  ;;  %v676_v59 = vpop.xlane.xlu0 %675 }
 0x3ce   :  { %v539_v60 = vpop.xlane.xlu2 %538  ;;  %v678_v61 = vsub.f32 %v669_v38, %v676_v59  ;;  %v818_v38 = vld [vmem:[#allocation2 + $0x58] sm:$0xff] }
 0x3cf   :  { %v543_v63 = vsub.f32 %v511_v34, %v539_v60  ;;  %v814_v34 = vld [vmem:[#allocation2 + $0x38] sm:$0xff]  ;;  %892 = vmatpush.msrb.mxu1 %v818_v38  ;;  %v995_v38 = vld [vmem:[%s1321_s9] ss:$0 sm:$0xff] }
 0x3d0   :  { %v681_v2 = vmul.f32 1.442695, %v678_v61  ;;  %968 = vmatmul.msk.f32.vlgmr.msra.gmra.mxu0 %vm73_vm1, %v443_v58 }
 0x3d1   :  { %v1017_v0 = vpop.eup %1016  ;;  %v545_v3 = vmul.f32 1.442695, %v543_v63  ;;  %893 = vmatpush.msrb.mxu1 %v817_v40 }
 0x3d2   :  { %v552_v5 = vsel %vm73_vm1, %v1017_v0, 0.0  ;;  %1018 = vpow2.f32 %v681_v2 }
 0x3d3   :  { %553 = vadd.xlane.f32.xlu2 %v552_v5  ;;  %1020 = vpow2.f32 %v545_v3 }
 0x3d5   :  { %v673_v6 = vpop.xlane.xlu0 %672 }
 0x3d6   :  { %v677_v7 = vsub.f32 %v643_v42, %v673_v6  ;;  %v816_v42 = vld [vmem:[#allocation2 + $0x48] sm:$0xff] }
 0x3d7   :  { %894 = vmatpush.msrb.mxu1 %v816_v42 }
 0x3d8   :  { %v1019_v8 = vpop.eup %1018  ;;  %v679_v9 = vmul.f32 1.442695, %v677_v7 }
 0x3d9   :  { %v1021_v10 = vpop.eup %1020  ;;  %v686_v11 = vsel %vm73_vm1, %v1019_v8, 0.0  ;;  %895 = vmatpush.msrb.mxu1 %v815_v44 }
 0x3da   :  { %1022 = vpow2.f32 %v679_v9  ;;  %687 = vadd.xlane.f32.xlu0 %v686_v11  ;;  %v549_v12 = vsel %vm73_vm1, %v1021_v10, 0.0 }
 0x3db   :  { %550 = vadd.xlane.f32.xlu2 %v549_v12 }
 0x3e0   :  { %v1023_v13 = vpop.eup %1022 }
 0x3e1   :  { %v683_v4 = vsel %vm73_vm1, %v1023_v13, 0.0 }
 0x3e2   :  { %684 = vadd.xlane.f32.xlu1 %v683_v4 }
 0x442   :  { %v380_v14 = vpop.f32.mrf.mxu3 }
 0x443   :  { %v851_v31 = vrot.slane %v380_v14, 7 }
 0x445   :  { %v357_v15 = vpop.f32.mrf.mxu0 }
 0x446   :  { %v554_v16 = vpop.xlane.xlu2 %553  ;;  %v852_v33 = vsel %vm825_vm2, %v851_v31, %v357_v15 }
 0x447   :  { %1024 = vrcp.f32 %v554_v16 }
 0x44a   :  { %v488_v17 = vpop.f32.mrf.mxu3 }
 0x44b   :  { %600 = vmatpush.msrb.mxu3 %v488_v17 }
 0x44d   :  { %v1025_v18 = vpop.eup %1024  ;;  %734 = vmatpush.msra.mxu3 %v1240_v62  ;;  %v465_v20 = vpop.f32.mrf.mxu0 }
 0x44e   :  { %v558_v19 = vmul.f32 %v1025_v18, %v1017_v0  ;;  %v688_v21 = vpop.xlane.xlu0 %687  ;;  %577 = vmatpush.msrb.mxu0 %v465_v20  ;;  %v551_v23 = vpop.xlane.xlu2 %550 }
 0x44f   :  { %1026 = vrcp.f32 %v688_v21 }
 0x450   :  { %1028 = vrcp.f32 %v551_v23  ;;  %975 = vmatmul.msk.f32.vlgmr.msrb.gmra.mxu3 %vm73_vm1, %v558_v19  ;;  %711 = vmatpush.msra.mxu0 %v1254_v1 }
 0x451   :  { %867 = vmatpush.msrb.mxu3 %v810_v22 }
 0x453   :  { %868 = vmatpush.msrb.mxu3 %v809_v24 }
 0x455   :  { %v1027_v27 = vpop.eup %1026  ;;  %869 = vmatpush.msrb.mxu3 %v808_v25  ;;  %v685_v29 = vpop.xlane.xlu1 %684 }
 0x456   :  { %v1029_v62 = vpop.eup %1028  ;;  %v692_v28 = vmul.f32 %v1027_v27, %v1019_v8  ;;  %1030 = vrcp.f32 %v685_v29 }
 0x457   :  { %v557_v30 = vmul.f32 %v1029_v62, %v1021_v10  ;;  %870 = vmatpush.msrb.mxu3 %v807_v26 }
 0x458   :  { %981 = vmatmul.msk.f32.vlgmr.msra.gmra.mxu3 %vm73_vm1, %v692_v28  ;;  %983 = vmatmul.msk.f32.vlgmr.msra.gmra.mxu2 %vm73_vm1, %v692_v28 }
 0x459   :  { %974 = vmatmul.msk.f32.vlgmr.msrb.gmra.mxu0 %vm73_vm1, %v557_v30 }
 0x45a   :  { %841 = vmatpush.msrb.mxu0 %v814_v34 }
 0x45c   :  { %v1031_v1 = vpop.eup %1030  ;;  %842 = vmatpush.msrb.mxu0 %v813_v35 }
 0x45d   :  { %v691_v32 = vmul.f32 %v1031_v1, %v1023_v13 }
 0x45e   :  { %843 = vmatpush.msrb.mxu0 %v812_v36 }
 0x45f   :  { %982 = vmatmul.msk.f32.vlgmr.msra.gmra.mxu1 %vm73_vm1, %v691_v32 }
 0x460   :  { %985 = vmatmul.msk.f32.vlgmr.msrb.gmra.mxu3 %vm84_vm0, %v852_v33  ;;  %844 = vmatpush.msrb.mxu0 %v811_v37 }
 0x461   :  { %980 = vmatmul.msk.f32.vlgmr.msra.gmra.mxu0 %vm73_vm1, %v691_v32 }
 0x4d3   :  { %v602_v46 = vpop.f32.mrf.mxu3 }
 0x4d4   :  { %v612_v47 = vsel %vm84_vm0, %v602_v46, -inf }
 0x4d5   :  { %v613_v48 = vrot.slane %v612_v47, 4 }
 0x4d6   :  { %v579_v49 = vpop.f32.mrf.mxu0 }
 0x4d7   :  { %v614_v50 = vmax.f32 %v612_v47, %v613_v48  ;;  %v605_v51 = vsel %vm84_vm0, %v579_v49, -inf }
 0x4d8   :  { %v606_v52 = vrot.slane %v605_v51, 4 }
 0x4d9   :  { %v615_v53 = vrot.slane %v614_v50, 2 }
 0x4da   :  { %v607_v54 = vmax.f32 %v605_v51, %v606_v52 }
 0x4db   :  { %v616_v55 = vmax.f32 %v614_v50, %v615_v53  ;;  %v736_v56 = vpop.f32.mrf.mxu3  ;;  %v790_v57 = vpop.f32.mrf.mxu2 }
 0x4dc   :  { %v608_v58 = vrot.slane %v607_v54, 2  ;;  %v746_v59 = vsel %vm84_vm0, %v736_v56, -inf  ;;  %v800_v60 = vsel %vm84_vm0, %v790_v57, -inf  ;;  %v770_v0 = vpop.f32.mrf.mxu1 }
 0x4dd   :  { %v747_v61 = vrot.slane %v746_v59, 4  ;;  %v801_v63 = vrot.slane %v800_v60, 4  ;;  %v617_v2 = vrot.slane %v616_v55, 1  ;;  %v793_v6 = vsel %vm84_vm0, %v770_v0, -inf }
 0x4de   :  { %v609_v3 = vmax.f32 %v607_v54, %v608_v58  ;;  %v713_v5 = vpop.f32.mrf.mxu0  ;;  %v794_v12 = vrot.slane %v793_v6, 4 }
 0x4df   :  { %v748_v7 = vmax.f32 %v746_v59, %v747_v61  ;;  %v802_v8 = vmax.f32 %v800_v60, %v801_v63  ;;  %v739_v9 = vsel %vm84_vm0, %v713_v5, -inf  ;;  %v618_v14 = vmax.f32 %v616_v55, %v617_v2 }
 0x4e0   :  { %v610_v10 = vrot.slane %v609_v3, 1  ;;  %v740_v11 = vrot.slane %v739_v9, 4  ;;  %v795_v17 = vmax.f32 %v793_v6, %v794_v12 }
 0x4e1   :  { %v749_v13 = vrot.slane %v748_v7, 2  ;;  %v803_v4 = vrot.slane %v802_v8, 2 }
 0x4e2   :  { %v611_v15 = vmax.f32 %v609_v3, %v610_v10  ;;  %v741_v16 = vmax.f32 %v739_v9, %v740_v11  ;;  %v796_v21 = vrot.slane %v795_v17, 2 }
 0x4e3   :  { %v750_v18 = vmax.f32 %v748_v7, %v749_v13  ;;  %v804_v19 = vmax.f32 %v802_v8, %v803_v4  ;;  %v872_v34 = vpop.f32.mrf.mxu3 }
 0x4e4   :  { %v742_v20 = vrot.slane %v741_v16, 2  ;;  %v826_v22 = vsel %vm825_vm2, %v618_v14, %v611_v15  ;;  %v797_v26 = vmax.f32 %v795_v17, %v796_v21 }
 0x4e5   :  { %984 = vmatmul.msk.f32.vlgmr.msrb.gmra.mxu0 %vm84_vm0, %v826_v22  ;;  %v751_v23 = vrot.slane %v750_v18, 1  ;;  %v805_v24 = vrot.slane %v804_v19, 1 }
 0x4e6   :  { %v743_v25 = vmax.f32 %v741_v16, %v742_v20  ;;  %v798_v62 = vrot.slane %v797_v26, 1 }
 0x4e7   :  { %v752_v28 = vmax.f32 %v750_v18, %v751_v23  ;;  %v806_v29 = vmax.f32 %v804_v19, %v805_v24 }
 0x4e8   :  { %v744_v27 = vrot.slane %v743_v25, 1  ;;  %v799_v31 = vmax.f32 %v797_v26, %v798_v62 }
 0x4ea   :  { %v745_v30 = vmax.f32 %v743_v25, %v744_v27  ;;  %v903_v32 = vsel %vm825_vm2, %v806_v29, %v799_v31 }
 0x4eb   :  { %987 = vmatmul.msk.f32.vlgmr.msrb.gmra.mxu2 %vm84_vm0, %v903_v32 }
 0x4ec   :  { %v877_v1 = vsel %vm825_vm2, %v752_v28, %v745_v30 }
 0x4ed   :  { %986 = vmatmul.msk.f32.vlgmr.msrb.gmra.mxu1 %vm84_vm0, %v877_v1 }
 0x562   :  { %v846_v33 = vpop.f32.mrf.mxu0 }
 0x563   :  { %v873_v36 = vadd.f32 %v872_v34, %v846_v33 }
 0x56a   :  { %v897_v35 = vpop.f32.mrf.mxu1 }
 0x56b   :  { %v900_v37 = vadd.f32 %v897_v35, %v873_v36 }
 0x56e   :  { %v923_v39 = vpop.f32.mrf.mxu2 }
 0x56f   :  { %v926_v40 = vadd.f32 %v923_v39, %v900_v37 }
 0x571   :  { %v931_v41 = vadd.f32 %v995_v38, %v926_v40 }
 0x573   :  { %932 = vst [vmem:[#allocation5] sm:$0x3] %v931_v41 }
 0x574   :  { %943 = dma.vmem_to_hbm [thread:$0]  %s939_s0, 32, %s941_s17, [#allocation4]  }
 0x575   :  { %1082 = dma.done.wait [#allocation4], 32  }
 0x576   :  { %1083 = vsyncadd [#allocation4], 4294967264 }
 0x577   :  { %948 = vsyncpa [#allocation3], 1 }
 0x578   :  { %949 = vsyncpa [#allocation4], 1 }

</bundles_post_ra>
